<compile_context>
chip_gen: v7x
topology: tpu7x:2x2x1
jax: 0.10.0
libtpu: 0.0.40
codegen_flags: <defaults>
</compile_context>

<pallas_src>
import math
import functools

import jax
import jax.numpy as jnp
from jax.experimental import pallas as pl
from jax.experimental.pallas import tpu as pltpu


def _round_up(x, m):
    return (x + m - 1) // m * m


# ---------------------------------------------------------------------------
# Fast path: small table resident in VMEM, gather via one-hot MXU matmul.
# ---------------------------------------------------------------------------
def _embed_onehot_kernel(ids_ref, emb_ref, out_ref, *, scale, vocab):
    """ids_ref: (T, 1) int32 VMEM; emb_ref: (vocab, d_model) VMEM (resident)."""
    ids = ids_ref[...]                                            # (T, 1)
    iota = jax.lax.broadcasted_iota(jnp.int32, (ids.shape[0], vocab), 1)
    onehot = (ids == iota).astype(emb_ref.dtype)                  # (T, vocab)
    acc = jnp.dot(onehot, emb_ref[...], preferred_element_type=jnp.float32)
    out_ref[...] = (acc * scale).astype(out_ref.dtype)


# ---------------------------------------------------------------------------
# General path: table in HBM, per-block row gather with cross-step double
# buffering.
# ---------------------------------------------------------------------------
def _embed_gather_kernel(ids_ref, emb_hbm, out_ref, vmem_buf, sem,
                         *, scale, block_tokens, n_inner):
    """Cross-step double-buffered row gather.

    ids_ref:  (n_pad,) int32 scalar-prefetched into SMEM
    emb_hbm:  (vocab, d_model) ref left in HBM (memory_space=pl.ANY)
    out_ref:  (block_tokens, d_model) VMEM output block
    vmem_buf: (2, block_tokens, d_model) VMEM gather landing slots
    sem:      (2,) DMA semaphores, one per slot (shared by that slot's T rows)
    """
    c = pl.program_id(0)           # "parallel" outer chunk (v7x 2-TC friendly)
    j = pl.program_id(1)           # "arbitrary" inner axis carries DMA state
    slot = j % 2

    def issue_block(block_idx, s):
        # Issue all T row gathers for `block_idx` into buffer slot `s`.
        base = block_idx * block_tokens
        for t in range(block_tokens):       # static unroll: dense descriptor issue
            tok = ids_ref[base + t]
            pltpu.make_async_copy(
                emb_hbm.at[pl.ds(tok, 1), :],
                vmem_buf.at[s, pl.ds(t, 1), :],
                sem.at[s],
            ).start()

    # Prime the pipeline at the start of this core's chunk.
    @pl.when(j == 0)
    def _():
        issue_block(c * n_inner, 0)

    # Prefetch the next block into the other slot *before* waiting on this one,
    # so its HBM latency overlaps this block's wait + scale + store.
    @pl.when(j + 1 < n_inner)
    def _():
        issue_block(c * n_inner + j + 1, 1 - slot)

    # Wait for this block's rows.  The wait descriptors use a static source row
    # (only the semaphore + dst byte count matter for a wait), so no SMEM id
    # reloads / address math land on the scalar slots here.
    for t in range(block_tokens):
        pltpu.make_async_copy(
            emb_hbm.at[pl.ds(0, 1), :],
            vmem_buf.at[slot, pl.ds(t, 1), :],
            sem.at[slot],
        ).wait()

    # Scale the whole sublane/lane-dense block and write it out in one store.
    out_ref[...] = (vmem_buf[slot] * scale).astype(out_ref.dtype)


# ---------------------------------------------------------------------------
# Wrapper
# ---------------------------------------------------------------------------
def input_embeddings(x, emb_table, *, block_tokens=256, use_resident_table=None):
    """x: (B, S) int ids; emb_table: (vocab, d_model).

    Returns (B, S, d_model) = emb_table[x] * sqrt(d_model).
    """
    B, S = x.shape
    vocab, d_model = emb_table.shape
    n_tok = B * S
    scale = math.sqrt(d_model)
    itemsize = jnp.dtype(emb_table.dtype).itemsize
    table_bytes = vocab * d_model * itemsize

    # Clamp ids (jnp.take clip semantics; keeps row DMAs in-bounds).
    # NOTE: PyTorch nn.Embedding raises on out-of-range ids instead.
    ids = jnp.clip(x.reshape(n_tok).astype(jnp.int32), 0, vocab - 1)

    if use_resident_table is None:
        use_resident_table = (table_bytes <= (4 << 20)) and (vocab <= 4096)

    if use_resident_table:
        # ---------------- VMEM-resident table, one-hot MXU gather ----------
        T = max(8, min(_round_up(n_tok, 8), 512))
        if n_tok % T:                       # prefer a T that divides n_tok
            for cand in range(T, 7, -8):
                if n_tok % cand == 0 and cand >= max(8, T // 4):
                    T = cand
                    break
        n_blocks = pl.cdiv(n_tok, T)
        n_pad = n_blocks * T
        ids_blk = ids if n_pad == n_tok else jnp.pad(ids, (0, n_pad - n_tok))
        ids_blk = ids_blk.reshape(n_pad, 1)

        cost = pl.CostEstimate(
            flops=2 * n_pad * vocab * d_model + n_pad * d_model,
            transcendentals=0,
            bytes_accessed=table_bytes + n_pad * d_model * itemsize + n_pad * 4)

        out_flat = pl.pallas_call(
            functools.partial(_embed_onehot_kernel, scale=scale, vocab=vocab),
            grid=(n_blocks,),
            in_specs=[
                pl.BlockSpec((T, 1), lambda i: (i, 0)),
                # Constant block index -> table DMA'd once and stays resident.
                pl.BlockSpec((vocab, d_model), lambda i: (0, 0)),
            ],
            out_specs=pl.BlockSpec((T, d_model), lambda i: (i, 0)),
            out_shape=jax.ShapeDtypeStruct((n_pad, d_model), emb_table.dtype),
            compiler_params=pltpu.CompilerParams(
                dimension_semantics=("parallel",)),
            cost_estimate=cost,
        )(ids_blk, emb_table)

    else:
        # ---------------- HBM table, manual row-gather DMA path ------------
        # Size T so (2 gather slots + 2 pipelined output slabs) fit in VMEM
        # with headroom (v7x has only 64 MiB per TensorCore).
        vmem_budget = 36 << 20
        t_cap = max(8, (vmem_budget // (4 * d_model * itemsize)) // 8 * 8)
        T = max(8, min(int(block_tokens) // 8 * 8 or 8, t_cap,
                       _round_up(n_tok, 8)))
        if n_tok % T:                       # prefer a T that divides n_tok
            for cand in range(T, 7, -8):
                if n_tok % cand == 0 and cand >= max(8, T // 4):
                    T = cand
                    break
        n_blocks = pl.cdiv(n_tok, T)
        # 2-way outer split: "parallel" outer axis can shard across v7x's two
        # TensorCores while the inner "arbitrary" axis carries the cross-step
        # DMA double-buffer state (prime happens at j == 0 of each chunk).
        n_outer = 2 if (n_blocks % 2 == 0 and n_blocks >= 2) else 1
        n_inner = n_blocks // n_outer
        n_pad = n_blocks * T
        ids_pad = ids if n_pad == n_tok else jnp.pad(ids, (0, n_pad - n_tok))
        # TODO(synk): for very long B*S (>~64K tokens) feed ids per-block via a
        # (T,) SMEM BlockSpec instead of scalar-prefetching the whole id array.

        cost = pl.CostEstimate(
            flops=n_pad * d_model,
            transcendentals=0,
            bytes_accessed=2 * n_pad * d_model * itemsize + n_pad * 4)

        grid_spec = pltpu.PrefetchScalarGridSpec(
            num_scalar_prefetch=1,                 # ids -> SMEM
            grid=(n_outer, n_inner),
            in_specs=[
                pl.BlockSpec(memory_space=pl.ANY),  # table stays in HBM
            ],
            out_specs=pl.BlockSpec(
                (T, d_model), lambda c, j, ids_ref: (c * n_inner + j, 0)),
            scratch_shapes=[
                pltpu.VMEM((2, T, d_model), emb_table.dtype),
                pltpu.SemaphoreType.DMA((2,)),
            ],
        )

        out_flat = pl.pallas_call(
            functools.partial(_embed_gather_kernel, scale=scale,
                              block_tokens=T, n_inner=n_inner),
            grid_spec=grid_spec,
            out_shape=jax.ShapeDtypeStruct((n_pad, d_model), emb_table.dtype),
            compiler_params=pltpu.CompilerParams(
                dimension_semantics=("parallel", "arbitrary"),
                vmem_limit_bytes=48 << 20),
            cost_estimate=cost,
        )(ids_pad, emb_table)

    if n_pad != n_tok:
        out_flat = out_flat[:n_tok]
    return out_flat.reshape(B, S, d_model)


if __name__ == "__main__":
    d_model = 32
    vocab_size = 64

    key = jax.random.PRNGKey(0)
    k_emb, k_ids1, k_ids3 = jax.random.split(key, 3)

    # Deterministic "parameters" (nn.Embedding weight: (vocab_size, d_model)).
    emb_table = jax.random.normal(k_emb, (vocab_size, d_model), dtype=jnp.float32)
    scale = math.sqrt(d_model)

    # Config 1: (B=2, S=8) -> auto-dispatch hits the VMEM-resident fast path.
    x1 = jax.random.randint(k_ids1, (2, 8), 0, vocab_size, dtype=jnp.int32)
    out1 = jax.block_until_ready(input_embeddings(x1, emb_table))
    ref1 = jnp.take(emb_table, x1, axis=0) * scale
    assert out1.shape == (2, 8, d_model)
    assert jnp.allclose(out1, ref1, atol=1e-5, rtol=1e-5)

    # Config 2: same shapes, force the HBM row-gather path (single block).
    out2 = jax.block_until_ready(
        input_embeddings(x1, emb_table, use_resident_table=False))
    assert jnp.allclose(out2, ref1, atol=1e-5, rtol=1e-5)

    # Config 3: more tokens with a small block size -> exercises the cross-step
    # gather double buffer and the 2-way "parallel" outer grid split.
    x3 = jax.random.randint(k_ids3, (2, 64), 0, vocab_size, dtype=jnp.int32)
    out3 = jax.block_until_ready(
        input_embeddings(x3, emb_table, block_tokens=16,
                         use_resident_table=False))
    ref3 = jnp.take(emb_table, x3, axis=0) * scale
    assert out3.shape == (2, 64, d_model)
    assert jnp.allclose(out3, ref3, atol=1e-5, rtol=1e-5)

    print("KERNEL_OK")
</pallas_src>

<mosaic_0001>
module attributes {stable_mosaic.version = 11 : i64} {
  func.func @_embed_onehot_kernel(%arg0: i32, %arg1: memref<16x1xi32, #tpu.memory_space<vmem>>, %arg2: memref<64x32xf32, #tpu.memory_space<vmem>>, %arg3: memref<16x32xf32, #tpu.memory_space<vmem>>) attributes {dimension_semantics = [#tpu.dimension_semantics<parallel>], iteration_bounds = array<i64: 1>, scalar_prefetch = 0 : i64, scratch_operands = 0 : i64, tpu.core_type = #tpu.core_type<tc>, window_params = [{transform_indices = @transform_0, window_bounds = array<i64: 16, 1>}, {pipeline_mode = #tpu.pipeline_mode<synchronous>, transform_indices = @transform_1, window_bounds = array<i64: 64, 32>}, {transform_indices = @transform_2, window_bounds = array<i64: 16, 32>}]} {
    %c0 = arith.constant 0 : index
    %c0_0 = arith.constant 0 : index
    %0 = vector.load %arg1[%c0, %c0_0] : memref<16x1xi32, #tpu.memory_space<vmem>>, vector<16x1xi32>
    %1 = tpu.iota {dimensions = array<i32: 1>} : vector<16x64xi32>
    %2 = vector.broadcast %0 : vector<16x1xi32> to vector<16x64xi32>
    %3 = arith.cmpi eq, %2, %1 : vector<16x64xi32>
    %4 = arith.extui %3 : vector<16x64xi1> to vector<16x64xi32>
    %5 = arith.sitofp %4 : vector<16x64xi32> to vector<16x64xf32>
    %c0_1 = arith.constant 0 : index
    %c0_2 = arith.constant 0 : index
    %6 = vector.load %arg2[%c0_1, %c0_2] : memref<64x32xf32, #tpu.memory_space<vmem>>, vector<64x32xf32>
    %cst = arith.constant dense<0.000000e+00> : vector<16x32xf32>
    %7 = tpu.matmul %5, %6, %cst {dimension_numbers = #tpu.dot_dimension_numbers<[1], [0], [0], [1], [0, 0, 1, 1], [], []>} : vector<16x64xf32>, vector<64x32xf32>, vector<16x32xf32> -> vector<16x32xf32>
    %cst_3 = arith.constant 5.65685415 : f32
    %8 = vector.broadcast %cst_3 : f32 to vector<16x32xf32>
    %9 = arith.mulf %7, %8 : vector<16x32xf32>
    %c0_4 = arith.constant 0 : index
    %c0_5 = arith.constant 0 : index
    %10 = vector.load %arg3[%c0_4, %c0_5] : memref<16x32xf32, #tpu.memory_space<vmem>>, vector<16x32xf32>
    tpu.vector_store %arg3[%c0_4, %c0_5], %9 {strides = array<i32>} : memref<16x32xf32, #tpu.memory_space<vmem>>, vector<16x32xf32>,
    return
  }
  func.func @transform_0(%arg0: i32) -> (i32, i32) {
    %c0_i32 = arith.constant 0 : i32
    %c0_i32_0 = arith.constant 0 : i32
    return %arg0, %c0_i32 : i32, i32
  }
  func.func @transform_1(%arg0: i32) -> (i32, i32) {
    %c0_i32 = arith.constant 0 : i32
    %c0_i32_0 = arith.constant 0 : i32
    %c0_i32_1 = arith.constant 0 : i32
    return %c0_i32, %c0_i32_0 : i32, i32
  }
  func.func @transform_2(%arg0: i32) -> (i32, i32) {
    %c0_i32 = arith.constant 0 : i32
    %c0_i32_0 = arith.constant 0 : i32
    return %arg0, %c0_i32 : i32, i32
  }
}

</mosaic_0001>

<bundles_post_ra>
// kernel: tpu_custom_call.1
= control target key start
LH: loop header
LB: loop body
LE: loop exit
PB: predicated region body
PF: predicated region fallthrough
CT: control target
= control target key end

     0   :  { %v218_v2 = vmov 0   ;;  %s280_s0 = inlined_call_operand.vmem [shape: s32[16,1], index: 0, kind: input, shape index: {}]   ;;  %s281_s1 = inlined_call_operand.vmem [shape: f32[64,32], index: 1, kind: input, shape index: {}]   ;;  %s282_s2 = inlined_call_operand.hbm [shape: f32[16,32], index: 2, kind: output, shape index: {}]  }
   0x1   :  { %v12_v0 = vld [vmem:[%s280_s0] sm:$0xff]  ;;  %193 = vset.pattern.permute.xlu0 %v218_v2  ;;  %v29_v3 = vld [vmem:[%s281_s1 + $0x8] sm:$0xff]  ;;  %v30_v4 = vld [vmem:[%s281_s1 + $0x10] sm:$0xff] }
   0x2   :  { %v28_v1 = vld [vmem:[%s281_s1] sm:$0xff]  ;;  %v31_v5 = vld [vmem:[%s281_s1 + $0x18] sm:$0xff]  ;;  %17 = vperm.xlu0 %193, %v12_v0   ;;  %v13_v6 = vld [vmem:[%s280_s0 + $0x8] sm:$0xff] }
   0x3   :  { %v172_v7 = vpack.c.bf16 %v29_v3, %v28_v1  ;;  %v176_v8 = vpack.c.bf16 %v31_v5, %v30_v4  ;;  %v32_v9 = vld [vmem:[%s281_s1 + $0x20] sm:$0xff]  ;;  %v33_v10 = vld [vmem:[%s281_s1 + $0x28] sm:$0xff] }
   0x4   :  { %7 = vsyncpa [#allocation3], 0  ;;  %v180_v11 = vpack.c.bf16 %v33_v10, %v32_v9  ;;  %v34_v12 = vld [vmem:[%s281_s1 + $0x30] sm:$0xff]  ;;  %v35_v13 = vld [vmem:[%s281_s1 + $0x38] sm:$0xff]  ;;  %v14_v15 = vlaneseq  ;;  %vm36_vm0 = vcmask 523264   ;;  %v219_v18 = vmov 0.0  }
   0x5   :  { %173 = vmatprep.subr.bf16.mxu0 %v172_v7  ;;  %v184_v14 = vpack.c.bf16 %v35_v13, %v34_v12  ;;  %s220_s28 = smov [#allocation2]   ;;  %vm120_vm3 = vcmask 261120  }
   0x6   :  { %175 = vmatpush3.bf16.msra.mxu0 %v172_v7  ;;  %20 = vperm.xlu0 %193, %v13_v6   ;;  %v15_v16 = vand.u32 127, %v14_v15  ;;  %s128_s1 = sshll.u32 %s220_s28, 4  ;;  %s129_s1 = int_to_ptr.vmem [resolvable:$true] %s128_s1 }
   0x7   :  { %177 = vmatprep.subr.bf16.mxu0 %v176_v8  ;;  %s194_s29 = scalar_lea.vmem %s129_s1, 256  ;;  %p199_p1 = scmp.lt.s32.totalorder %s129_s1, %s129_s1 }
   0x8   :  { %p195_p0 = scmp.ne.s32.totalorder %s129_s1, %s194_s29  ;;  %p200_p2 = scmp.lt.s32.totalorder %s194_s29, %s194_s29 }
   0xa   :  { %179 = vmatpush3.bf16.msra.mxu0 %v176_v8  ;;  %p201_p3 = por %p200_p2, %p199_p1 }
   0xb   :  { %181 = vmatprep.subr.bf16.mxu0 %v180_v11 }
   0xc   :  { %p202_p4 = pnand %p201_p3, %p195_p0 }
   0xe   :  { %183 = vmatpush3.bf16.msra.mxu0 %v180_v11 }
   0xf   :  { %185 = vmatprep.subr.bf16.mxu0 %v184_v14 }
  0x12   :  { %187 = vmatpush3.bf16.msra.mxu0 %v184_v14 }
  0x81   :  { %v18_v17 = vpop.permute.xlu0 %17 }
  0x82   :  { %vm22_vm1 = vcmp.eq.s32.totalorder %v18_v17, %v15_v16 }
  0x83   :  { %v139_v19 = vsel %vm22_vm1, 1.0, %v219_v18 }
  0x84   :  { %169 = vmatprep.mubr.msk.f32.mxu0 %vm36_vm0, %v139_v19 }
  0x85   :  { %v21_v20 = vpop.permute.xlu0 %20 }
  0x86   :  { %vm23_vm2 = vcmp.eq.s32.totalorder %v21_v20, %v15_v16 }
  0x87   :  { %v140_v21 = vsel %vm23_vm2, 1.0, %v219_v18 }
  0x88   :  { %170 = vmatmul.mubr.msk.f32.vlgmr.msra.gmra.mrb[0].mxu0 %vm36_vm0, %v140_v21 }
 0x15b   :  { %v171_v22 = vpop.f32.mrb[0].mxu0 }
 0x15c   :  { %v119_v23 = vmul.f32 5.656854, %v171_v22  ;;  %v109_v24 = vpop.f32.mrb[1].mxu0 }
 0x15d   :  { %v118_v25 = vmul.f32 5.656854, %v109_v24 }
 0x15e   :  { %122 = vst.msk [vmem:[#allocation2 + $0x8] sm:$0xff] %vm120_vm3, %v119_v23 }
 0x15f   :  { %121 = vst.msk [vmem:[#allocation2] sm:$0xff] %vm120_vm3, %v118_v25 }
 0x160   :  { %205 = shalt.err (!%p202_p4)
}
 0x161   :  { %s206_s4 = scalar_lea.hbm %s282_s2, 256 }
 0x162   :  { %p207_p5 = scmp.ne.s32.totalorder %s282_s2, %s206_s4  ;;  %p210_p6 = scmp.lt.u32.totalorder %s206_s4, %s282_s2 }
 0x164   :  { %p212_p7 = pnand %p210_p6, %p207_p5 }
 0x166   :  { %215 = shalt.err (!%p212_p7)
}
 0x167   :  { %s221_s9 = smov 128   ;;  %s222_s10 = smov 8  }
 0x168   :  { %134 = dma.vmem_to_hbm [thread:$0]  %s129_s1, 256, %s282_s2, [#allocation3], %s221_s9, %s221_s9, %s222_s10  }
 0x169   :  { %216 = dma.done.wait [#allocation3], 256  }
 0x16a   :  { %217 = vsyncadd [#allocation3], 4294967040 }
 0x16b   :  { %138 = vsyncpa [#allocation3], 1 }

</bundles_post_ra>
